<compile_context>
chip_gen: v5e
topology: v5e:2x2
jax: 0.10.0
libtpu: 0.0.40
codegen_flags: <defaults>
</compile_context>

<pallas_src>
import functools

import jax
import jax.numpy as jnp
from jax.experimental import pallas as pl
from jax.experimental.pallas import tpu as pltpu


# ------------------------------ Pallas kernel -------------------------------

def _ca_layer_kernel(x_ref, w1t_ref, w2_ref, o_ref):
    # x_ref / o_ref : (1, C, HW)   one image, channels on sublanes, HW on lanes
    # w1t_ref       : (C, Cr)      conv_du[0] weight, transposed  (Cin, Cout)
    # w2_ref        : (C, Cr)      conv_du[2] weight, natural     (Cout, Cin)
    x = x_ref[0].astype(jnp.float32)                       # (C, HW)

    # AdaptiveAvgPool2d(1): mean over all spatial positions (lane reduce).
    mean = jnp.mean(x, axis=-1, keepdims=True)             # (C, 1)

    # conv1x1 (C -> Cr, bias=False) + ReLU :
    #   y1[r] = sum_c w1[r, c] * mean[c]
    w1t = w1t_ref[...].astype(jnp.float32)                 # (C, Cr)
    y1 = jnp.sum(w1t * mean, axis=0, keepdims=True)        # (1, Cr)  sublane reduce
    y1 = jnp.maximum(y1, 0.0)

    # conv1x1 (Cr -> C, bias=False) + Sigmoid :
    #   y2[c] = sum_r w2[c, r] * y1[r]
    w2 = w2_ref[...].astype(jnp.float32)                   # (C, Cr)
    y2 = jnp.sum(w2 * y1, axis=-1, keepdims=True)          # (C, 1)   lane reduce
    gate = 1.0 / (1.0 + jnp.exp(-y2))                      # sigmoid, (C, 1)

    # Channel-wise gating: broadcast the per-channel scalar across lanes.
    o_ref[...] = (x * gate)[None].astype(o_ref.dtype)


# ------------------------------ wrapper --------------------------------------

def ca_layer_forward(x_nchw, conv1_w, conv2_w):
    """CALayer forward.

    x_nchw  : (B, C, H, W)            float32, NCHW (PyTorch layout)
    conv1_w : (C//r, C, 1, 1)         conv_du[0].weight
    conv2_w : (C, C//r, 1, 1)         conv_du[2].weight
    """
    B, C, H, W = x_nchw.shape
    Cr = conv1_w.shape[0]
    HW = H * W

    x = x_nchw.reshape(B, C, HW)                           # contiguous, free
    w1t = jnp.transpose(conv1_w.reshape(Cr, C))            # (C, Cr)
    w2 = conv2_w.reshape(C, Cr)                            # (C, Cr)

    y = pl.pallas_call(
        _ca_layer_kernel,
        out_shape=jax.ShapeDtypeStruct((B, C, HW), x_nchw.dtype),
        grid=(B,),
        in_specs=[
            pl.BlockSpec((1, C, HW), lambda i: (i, 0, 0)),
            pl.BlockSpec((C, Cr), lambda i: (0, 0)),
            pl.BlockSpec((C, Cr), lambda i: (0, 0)),
        ],
        out_specs=pl.BlockSpec((1, C, HW), lambda i: (i, 0, 0)),
        compiler_params=pltpu.CompilerParams(
            dimension_semantics=("parallel",)),
    )(x, w1t, w2)
    return y.reshape(B, C, H, W)


# ------------------------------ reference ------------------------------------

def _ca_layer_reference(x, conv1_w, conv2_w):
    B, C, H, W = x.shape
    Cr = conv1_w.shape[0]
    w1 = conv1_w.reshape(Cr, C)
    w2 = conv2_w.reshape(C, Cr)
    pooled = jnp.mean(x, axis=(2, 3))                      # (B, C)
    y1 = jnp.maximum(pooled @ w1.T, 0.0)                   # (B, Cr)
    y2 = y1 @ w2.T                                         # (B, C)
    gate = 1.0 / (1.0 + jnp.exp(-y2))
    return x * gate[:, :, None, None]


# ------------------------------ main ------------------------------------------

if __name__ == "__main__":
    key = jax.random.PRNGKey(0)
    kx, k1, k2 = jax.random.split(key, 3)

    B, C, H, W = 2, 64, 16, 16
    reduction = 16
    Cr = C // reduction

    x = jax.random.normal(kx, (B, C, H, W), jnp.float32)
    conv1_w = 0.1 * jax.random.normal(k1, (Cr, C, 1, 1), jnp.float32)
    conv2_w = 0.1 * jax.random.normal(k2, (C, Cr, 1, 1), jnp.float32)

    fwd = jax.jit(ca_layer_forward)
    out = fwd(x, conv1_w, conv2_w)
    jax.block_until_ready(out)

    ref = _ca_layer_reference(x, conv1_w, conv2_w)
    assert out.shape == (B, C, H, W) and out.dtype == jnp.float32
    assert jnp.allclose(out, ref, rtol=1e-4, atol=1e-5), "mismatch vs reference"

    print("KERNEL_OK")
</pallas_src>

<mosaic_0001>
module attributes {stable_mosaic.version = 11 : i64} {
  func.func @_ca_layer_kernel(%arg0: i32, %arg1: memref<1x64x256xf32, #tpu.memory_space<vmem>>, %arg2: memref<64x4xf32, #tpu.memory_space<vmem>>, %arg3: memref<64x4xf32, #tpu.memory_space<vmem>>, %arg4: memref<1x64x256xf32, #tpu.memory_space<vmem>>) attributes {dimension_semantics = [#tpu.dimension_semantics<parallel>], iteration_bounds = array<i64: 2>, scalar_prefetch = 0 : i64, scratch_operands = 0 : i64, tpu.core_type = #tpu.core_type<tc>, window_params = [{transform_indices = @transform_0, window_bounds = array<i64: 1, 64, 256>}, {pipeline_mode = #tpu.pipeline_mode<synchronous>, transform_indices = @transform_1, window_bounds = array<i64: 64, 4>}, {pipeline_mode = #tpu.pipeline_mode<synchronous>, transform_indices = @transform_2, window_bounds = array<i64: 64, 4>}, {transform_indices = @transform_3, window_bounds = array<i64: 1, 64, 256>}]} {
    %c0 = arith.constant 0 : index
    %c0_0 = arith.constant 0 : index
    %c0_1 = arith.constant 0 : index
    %0 = vector.load %arg1[%c0, %c0_0, %c0_1] : memref<1x64x256xf32, #tpu.memory_space<vmem>>, vector<1x64x256xf32>
    %1 = vector.shape_cast %0 : vector<1x64x256xf32> to vector<64x256xf32>
    %cst = arith.constant dense<0.000000e+00> : vector<64xf32>
    %2 = vector.multi_reduction <add>, %1, %cst [1] : vector<64x256xf32> to vector<64xf32>
    %3 = vector.shape_cast %2 : vector<64xf32> to vector<64x1xf32>
    %cst_2 = arith.constant 2.560000e+02 : f32
    %4 = vector.broadcast %cst_2 : f32 to vector<64x1xf32>
    %5 = arith.divf %3, %4 : vector<64x1xf32>
    %c0_3 = arith.constant 0 : index
    %c0_4 = arith.constant 0 : index
    %6 = vector.load %arg2[%c0_3, %c0_4] : memref<64x4xf32, #tpu.memory_space<vmem>>, vector<64x4xf32>
    %7 = vector.broadcast %5 : vector<64x1xf32> to vector<64x4xf32>
    %8 = arith.mulf %6, %7 : vector<64x4xf32>
    %cst_5 = arith.constant dense<0.000000e+00> : vector<4xf32>
    %9 = vector.multi_reduction <add>, %8, %cst_5 [0] : vector<64x4xf32> to vector<4xf32>
    %10 = vector.shape_cast %9 : vector<4xf32> to vector<1x4xf32>
    %cst_6 = arith.constant 0.000000e+00 : f32
    %11 = vector.broadcast %cst_6 : f32 to vector<1x4xf32>
    %12 = arith.maximumf %10, %11 : vector<1x4xf32>
    %c0_7 = arith.constant 0 : index
    %c0_8 = arith.constant 0 : index
    %13 = vector.load %arg3[%c0_7, %c0_8] : memref<64x4xf32, #tpu.memory_space<vmem>>, vector<64x4xf32>
    %14 = vector.broadcast %12 : vector<1x4xf32> to vector<64x4xf32>
    %15 = arith.mulf %13, %14 : vector<64x4xf32>
    %cst_9 = arith.constant dense<0.000000e+00> : vector<64xf32>
    %16 = vector.multi_reduction <add>, %15, %cst_9 [1] : vector<64x4xf32> to vector<64xf32>
    %17 = vector.shape_cast %16 : vector<64xf32> to vector<64x1xf32>
    %cst_10 = arith.constant 0.000000e+00 : f32
    %18 = vector.broadcast %cst_10 : f32 to vector<64x1xf32>
    %19 = arith.subf %18, %17 : vector<64x1xf32>
    %20 = math.exp %19 : vector<64x1xf32>
    %cst_11 = arith.constant 1.000000e+00 : f32
    %21 = vector.broadcast %cst_11 : f32 to vector<64x1xf32>
    %22 = arith.addf %21, %20 : vector<64x1xf32>
    %cst_12 = arith.constant 1.000000e+00 : f32
    %23 = vector.broadcast %cst_12 : f32 to vector<64x1xf32>
    %24 = arith.divf %23, %22 : vector<64x1xf32>
    %25 = vector.broadcast %24 : vector<64x1xf32> to vector<64x256xf32>
    %26 = arith.mulf %1, %25 : vector<64x256xf32>
    %27 = vector.shape_cast %26 : vector<64x256xf32> to vector<1x64x256xf32>
    %c0_13 = arith.constant 0 : index
    %c0_14 = arith.constant 0 : index
    %c0_15 = arith.constant 0 : index
    %28 = vector.load %arg4[%c0_13, %c0_14, %c0_15] : memref<1x64x256xf32, #tpu.memory_space<vmem>>, vector<1x64x256xf32>
    tpu.vector_store %arg4[%c0_13, %c0_14, %c0_15], %27 {strides = array<i32>} : memref<1x64x256xf32, #tpu.memory_space<vmem>>, vector<1x64x256xf32>,
    return
  }
  func.func @transform_0(%arg0: i32) -> (i32, i32, i32) {
    %c0_i32 = arith.constant 0 : i32
    %c0_i32_0 = arith.constant 0 : i32
    %c0_i32_1 = arith.constant 0 : i32
    return %arg0, %c0_i32, %c0_i32_0 : i32, i32, i32
  }
  func.func @transform_1(%arg0: i32) -> (i32, i32) {
    %c0_i32 = arith.constant 0 : i32
    %c0_i32_0 = arith.constant 0 : i32
    %c0_i32_1 = arith.constant 0 : i32
    return %c0_i32, %c0_i32_0 : i32, i32
  }
  func.func @transform_2(%arg0: i32) -> (i32, i32) {
    %c0_i32 = arith.constant 0 : i32
    %c0_i32_0 = arith.constant 0 : i32
    %c0_i32_1 = arith.constant 0 : i32
    return %c0_i32, %c0_i32_0 : i32, i32
  }
  func.func @transform_3(%arg0: i32) -> (i32, i32, i32) {
    %c0_i32 = arith.constant 0 : i32
    %c0_i32_0 = arith.constant 0 : i32
    %c0_i32_1 = arith.constant 0 : i32
    return %arg0, %c0_i32, %c0_i32_0 : i32, i32, i32
  }
}

</mosaic_0001>

<bundles_post_ra>
// kernel: ca_layer_forward.1
= control target key start
LH: loop header
LB: loop body
LE: loop exit
PB: predicated region body
PF: predicated region fallthrough
CT: control target
= control target key end

     0   :  { %s629_s12 = smov 0   ;;  %s875_s0 = inlined_call_operand.vmem [shape: f32[2,64,256], index: 0, kind: input, shape index: {}]   ;;  %s876_s1 = inlined_call_operand.vmem [shape: f32[64,4], index: 1, kind: input, shape index: {}]   ;;  %s877_s2 = inlined_call_operand.vmem [shape: f32[64,4], index: 2, kind: input, shape index: {}]   ;;  %s878_s3 = inlined_call_operand.vmem [shape: f32[2,64,256], index: 3, kind: output, shape index: {}]  }
   0x1 LB: > { %s544_s13 = sadd.s32 4294967295, %s606_s12   ;;  %p548_p0 = scmp.ge.s32.totalorder %s606_s12, 1  ;;  %s606_s12 = sphi %s629_s12, %s13_s12  }
   0x2   : > { %p137_p1 = scmp.lt.s32.totalorder %s606_s12, 3 }
   0x4   : > { %p138_p2 = pnand %p548_p0, %p137_p1 }
   0x5   : > { %p161_p3 = scmp.lt.s32.totalorder (!%p138_p2), %s544_s13, 1 }
   0x6   : > { %141 = sbr.rel (%p138_p2) target bundleno = 349 (0x15d), region = 32 }
   0xb   : > { %s888_s13 = smov (!%p161_p3, %s544_s13), 1  ;;  %v608_v24 = vmov 256.0   ;;  %v226_v35 = vld [vmem:[%s876_s1] sm:$0xff]  ;;  %v228_v37 = vld [vmem:[%s876_s1 + $0x10] sm:$0xff]  ;;  %v227_v38 = vld [vmem:[%s876_s1 + $0x8] sm:$0xff]  ;;  %vm242_vm1 = vcmask 31744  }
   0xc   : > { %s555_s14 = sshll.u32 %s888_s13, 7  ;;  %566 = vrcp.f32 %v608_v24  ;;  %v229_v42 = vld [vmem:[%s876_s1 + $0x18] sm:$0xff]  ;;  %v230_v50 = vld [vmem:[%s876_s1 + $0x20] sm:$0xff]  ;;  %v231_v52 = vld [vmem:[%s876_s1 + $0x28] sm:$0xff] }
   0xd   : > { %s165_s17 = scalar_lea.vmem %s875_s0, %s555_s14  ;;  %v232_v61 = vld [vmem:[%s876_s1 + $0x30] sm:$0xff]  ;;  %s795_s28 = scalar_lea.vmem %s878_s3, %s555_s14 }
   0xe   : > { %v645_v0 = vld [vmem:[%s165_s17] sm:$0xff]  ;;  %v647_v1 = vld [vmem:[%s165_s17 + $0x8] sm:$0xff]  ;;  %v663_v9 = vld [vmem:[%s165_s17 + $0x10] sm:$0xff] }
   0xf   : > { %v649_v2 = vld [vmem:[%s165_s17 + $0x20] sm:$0xff]  ;;  %v187_v3 = vadd.f32 %v647_v1, %v645_v0  ;;  %v653_v4 = vld [vmem:[%s165_s17 + $0x28] sm:$0xff]  ;;  %v665_v10 = vld [vmem:[%s165_s17 + $0x18] sm:$0xff] }
  0x10   : > { %v655_v5 = vld [vmem:[%s165_s17 + $0x40] sm:$0xff]  ;;  %v657_v6 = vld [vmem:[%s165_s17 + $0x48] sm:$0xff]  ;;  %v193_v7 = vadd.f32 %v653_v4, %v649_v2  ;;  %v667_v11 = vld [vmem:[%s165_s17 + $0x30] sm:$0xff]  ;;  %v190_v15 = vadd.f32 %v665_v10, %v663_v9 }
  0x11   : > { %v199_v8 = vadd.f32 %v657_v6, %v655_v5  ;;  %188 = vadd.xlane.f32.xlu0 %v187_v3  ;;  %v669_v12 = vld [vmem:[%s165_s17 + $0x38] sm:$0xff]  ;;  %v671_v13 = vld [vmem:[%s165_s17 + $0x50] sm:$0xff]  ;;  %v681_v18 = vld [vmem:[%s165_s17 + $0x60] sm:$0xff] }
  0x12   : > { %194 = vadd.xlane.f32.xlu1 %v193_v7  ;;  %v673_v14 = vld [vmem:[%s165_s17 + $0x58] sm:$0xff]  ;;  %v196_v16 = vadd.f32 %v669_v12, %v667_v11  ;;  %v683_v19 = vld [vmem:[%s165_s17 + $0x68] sm:$0xff]  ;;  %v685_v20 = vld [vmem:[%s165_s17 + $0x70] sm:$0xff]  ;;  %v567_v25 = vpop.eup %566 }
  0x13   : > { %200 = vadd.xlane.f32.xlu2 %v199_v8  ;;  %v202_v17 = vadd.f32 %v673_v14, %v671_v13  ;;  %v687_v21 = vld [vmem:[%s165_s17 + $0x78] sm:$0xff]  ;;  %v205_v22 = vadd.f32 %v683_v19, %v681_v18  ;;  %v212_v26 = vmul.f32 256.0, %v567_v25  ;;  %vm216_vm0 = vweird.f32 %v567_v25 }
  0x14   : > { %v208_v23 = vadd.f32 %v687_v21, %v685_v20  ;;  %v233_v3 = vld [vmem:[%s876_s1 + $0x38] sm:$0xff] }
  0x15   : > { %v213_v27 = vsub.f32 1.0, %v212_v26 }
  0x17   : > { %v214_v28 = vmul.f32 %v567_v25, %v213_v27 }
  0x19   : > { %191 = vadd.xlane.f32.xlu0 %v190_v15  ;;  %v215_v29 = vadd.f32 %v567_v25, %v214_v28 }
  0x1a   : > { %197 = vadd.xlane.f32.xlu1 %v196_v16 }
  0x1b   : > { %203 = vadd.xlane.f32.xlu2 %v202_v17  ;;  %v217_v33 = vsel %vm216_vm0, %v567_v25, %v215_v29 }
  0x21   : > { %206 = vadd.xlane.f32.xlu0 %v205_v22 }
  0x22   : > { %209 = vadd.xlane.f32.xlu1 %v208_v23 }
  0x84   : > { %v189_v30 = vpop.xlane.xlu0 %188 }
  0x85   : > { %v195_v31 = vpop.xlane.xlu1 %194  ;;  %v218_v34 = vmul.f32 %v217_v33, %v189_v30 }
  0x86   : > { %v201_v32 = vpop.xlane.xlu2 %200  ;;  %v220_v36 = vmul.f32 %v217_v33, %v195_v31 }
  0x87   : > { %v234_v40 = vmul.f32 %v226_v35, %v218_v34  ;;  %v222_v47 = vmul.f32 %v217_v33, %v201_v32 }
  0x88   : > { %v236_v46 = vmul.f32 %v228_v37, %v220_v36  ;;  %v267_v36 = vld [vmem:[%s877_s2 + $0x10] sm:$0xff]  ;;  %v266_v37 = vld [vmem:[%s877_s2 + $0x8] sm:$0xff] }
  0x89   : > { %v243_v53 = vsel %vm242_vm1, %v234_v40, 0.0  ;;  %v238_v57 = vmul.f32 %v230_v50, %v222_v47  ;;  %v269_v47 = vld [vmem:[%s877_s2 + $0x20] sm:$0xff] }
  0x8a   : > { %v246_v56 = vsel %vm242_vm1, %v236_v46, 0.0  ;;  %v270_v46 = vld [vmem:[%s877_s2 + $0x28] sm:$0xff] }
  0x8b   : > { %v250_v16 = vsel %vm242_vm1, %v238_v57, 0.0 }
  0x8c   : > { %v192_v39 = vpop.xlane.xlu0 %191 }
  0x8d   : > { %v219_v41 = vmul.f32 %v217_v33, %v192_v39  ;;  %v198_v43 = vpop.xlane.xlu1 %197 }
  0x8e   : > { %v204_v44 = vpop.xlane.xlu2 %203  ;;  %v221_v45 = vmul.f32 %v217_v33, %v198_v43 }
  0x8f   : > { %v235_v48 = vmul.f32 %v227_v38, %v219_v41  ;;  %v223_v49 = vmul.f32 %v217_v33, %v204_v44  ;;  %v265_v38 = vld [vmem:[%s877_s2] sm:$0xff] }
  0x90   : > { %v237_v51 = vmul.f32 %v229_v42, %v221_v45 }
  0x91   : > { %v244_v54 = vsel %vm242_vm1, %v235_v48, 0.0  ;;  %v239_v59 = vmul.f32 %v231_v52, %v223_v49  ;;  %v268_v48 = vld [vmem:[%s877_s2 + $0x18] sm:$0xff] }
  0x92   : > { %v245_v55 = vadd.f32 %v244_v54, %v243_v53  ;;  %v248_v58 = vsel %vm242_vm1, %v237_v51, 0.0 }
  0x93   : > { %v252_v17 = vsel %vm242_vm1, %v239_v59, 0.0 }
  0x94   : > { %v247_v60 = vadd.f32 %v246_v56, %v245_v55  ;;  %v207_v62 = vpop.xlane.xlu0 %206  ;;  %v272_v55 = vld [vmem:[%s877_s2 + $0x38] sm:$0xff]  ;;  %v271_v56 = vld [vmem:[%s877_s2 + $0x30] sm:$0xff] }
  0x95   : > { %v224_v63 = vmul.f32 %v217_v33, %v207_v62  ;;  %v210_v7 = vpop.xlane.xlu1 %209 }
  0x96   : > { %v249_v8 = vadd.f32 %v248_v58, %v247_v60  ;;  %v225_v15 = vmul.f32 %v217_v33, %v210_v7 }
  0x97   : > { %v240_v22 = vmul.f32 %v232_v61, %v224_v63 }
  0x98   : > { %v251_v23 = vadd.f32 %v250_v16, %v249_v8  ;;  %v241_v24 = vmul.f32 %v233_v3, %v225_v15 }
  0x99   : > { %v254_v25 = vsel %vm242_vm1, %v240_v22, 0.0 }
  0x9a   : > { %v253_v26 = vadd.f32 %v252_v17, %v251_v23  ;;  %v256_v27 = vsel %vm242_vm1, %v241_v24, 0.0 }
  0x9c   : > { %v255_v28 = vadd.f32 %v254_v25, %v253_v26 }
  0x9e   : > { %v257_v29 = vadd.f32 %v256_v27, %v255_v28 }
  0xa0   : > { %v258_v30 = vrot.slane %v257_v29, 4 }
  0xa2   : > { %v259_v31 = vadd.f32 %v258_v30, %v257_v29 }
  0xa4   : > { %v260_v32 = vrot.slane %v259_v31, 2 }
  0xa6   : > { %v261_v34 = vadd.f32 %v260_v32, %v259_v31 }
  0xa8   : > { %v262_v35 = vrot.slane %v261_v34, 1 }
  0xaa   : > { %v263_v33 = vadd.f32 %v262_v35, %v261_v34 }
  0xac   : > { %v264_v39 = vmax.f32 %v263_v33, 0.0 }
  0xae   : > { %v275_v40 = vmul.f32 %v267_v36, %v264_v39  ;;  %v274_v41 = vmul.f32 %v266_v37, %v264_v39  ;;  %v273_v42 = vmul.f32 %v265_v38, %v264_v39  ;;  %v278_v49 = vmul.f32 %v270_v46, %v264_v39 }
  0xaf   : > { %v277_v50 = vmul.f32 %v269_v47, %v264_v39  ;;  %v276_v51 = vmul.f32 %v268_v48, %v264_v39  ;;  %v280_v57 = vmul.f32 %v272_v55, %v264_v39  ;;  %v279_v58 = vmul.f32 %v271_v56, %v264_v39 }
  0xb0   : > { %v287_v43 = vsel %vm242_vm1, %v275_v40, 0.0  ;;  %v284_v44 = vsel %vm242_vm1, %v274_v41, 0.0  ;;  %v281_v45 = vsel %vm242_vm1, %v273_v42, 0.0  ;;  %v296_v52 = vsel %vm242_vm1, %v278_v49, 0.0 }
  0xb1   : > { %288 = vadd.xlane.f32.xlu1 %v287_v43  ;;  %285 = vadd.xlane.f32.xlu0 %v284_v44  ;;  %v293_v53 = vsel %vm242_vm1, %v277_v50, 0.0  ;;  %v290_v54 = vsel %vm242_vm1, %v276_v51, 0.0  ;;  %v302_v59 = vsel %vm242_vm1, %v280_v57, 0.0  ;;  %v299_v60 = vsel %vm242_vm1, %v279_v58, 0.0 }
  0xb2   : > { %282 = vadd.xlane.f32.xlu2 %v281_v45 }
  0xb9   : > { %297 = vadd.xlane.f32.xlu1 %v296_v52  ;;  %294 = vadd.xlane.f32.xlu0 %v293_v53 }
  0xba   : > { %291 = vadd.xlane.f32.xlu2 %v290_v54 }
  0xc1   : > { %303 = vadd.xlane.f32.xlu0 %v302_v59 }
  0xc2   : > { %300 = vadd.xlane.f32.xlu2 %v299_v60 }
 0x124   : > { %v289_v61 = vpop.xlane.xlu1 %288  ;;  %v286_v62 = vpop.xlane.xlu0 %285 }
 0x125   : > { %v307_v63 = vsub.f32 0.0, %v289_v61  ;;  %v306_v3 = vsub.f32 0.0, %v286_v62  ;;  %v283_v7 = vpop.xlane.xlu2 %282 }
 0x126   : > { %v305_v8 = vsub.f32 0.0, %v283_v7 }
 0x127   : > { %v317_v15 = vmul.f32 1.442695, %v307_v63  ;;  %v315_v16 = vmul.f32 1.442695, %v306_v3 }
 0x128   : > { %v313_v17 = vmul.f32 1.442695, %v305_v8 }
 0x129   : > { %568 = vpow2.f32 %v317_v15 }
 0x12a   : > { %570 = vpow2.f32 %v315_v16 }
 0x12b   : > { %572 = vpow2.f32 %v313_v17 }
 0x12c   : > { %v298_v22 = vpop.xlane.xlu1 %297  ;;  %v295_v23 = vpop.xlane.xlu0 %294 }
 0x12d   : > { %v310_v24 = vsub.f32 0.0, %v298_v22  ;;  %v309_v25 = vsub.f32 0.0, %v295_v23  ;;  %v292_v26 = vpop.xlane.xlu2 %291 }
 0x12e   : > { %v308_v27 = vsub.f32 0.0, %v292_v26 }
 0x12f   : > { %v569_v28 = vpop.eup %568  ;;  %v323_v29 = vmul.f32 1.442695, %v310_v24  ;;  %v321_v32 = vmul.f32 1.442695, %v309_v25 }
 0x130   : > { %v571_v30 = vpop.eup %570  ;;  %v331_v31 = vadd.f32 1.0, %v569_v28  ;;  %v319_v33 = vmul.f32 1.442695, %v308_v27 }
 0x131   : > { %v573_v34 = vpop.eup %572  ;;  %v330_v35 = vadd.f32 1.0, %v571_v30  ;;  %574 = vpow2.f32 %v323_v29 }
 0x132   : > { %576 = vrcp.f32 %v331_v31  ;;  %v757_v36 = vadd.f32 1.0, %v573_v34  ;;  %v376_v40 = vand.u32 2147483647, %v331_v31  ;;  %v378_v41 = vand.u32 2147483648, %v331_v31 }
 0x133   : > { %578 = vrcp.f32 %v330_v35  ;;  %v361_v43 = vand.u32 2147483647, %v330_v35  ;;  %v363_v46 = vand.u32 2147483648, %v330_v35  ;;  %vm372_vm2 = vweird.f32 %v331_v31 }
 0x134   : > { %580 = vpow2.f32 %v321_v32  ;;  %v304_v37 = vpop.xlane.xlu0 %303  ;;  %vm357_vm3 = vweird.f32 %v330_v35  ;;  %vm762_vm4 = vcmp.eq.f32.partialorder %v376_v40, 8.507059e+37  ;;  %v379_v54 = vor.u32 1.1754944e-38, %v378_v41 }
 0x135   : > { %582 = vpow2.f32 %v319_v33  ;;  %v312_v38 = vsub.f32 0.0, %v304_v37  ;;  %v301_v39 = vpop.xlane.xlu2 %300  ;;  %vm767_vm5 = vcmp.eq.f32.partialorder %v361_v43, 8.507059e+37  ;;  %v346_v59 = vand.u32 2147483647, %v757_v36 }
 0x136   : > { %584 = vrcp.f32 %v757_v36  ;;  %v311_v44 = vsub.f32 0.0, %v301_v39  ;;  %v364_v63 = vor.u32 1.1754944e-38, %v363_v46  ;;  %v348_v16 = vand.u32 2147483648, %v757_v36 }
 0x137   : > { %v575_v42 = vpop.eup %574  ;;  %v327_v48 = vmul.f32 1.442695, %v312_v38  ;;  %vm342_vm8 = vweird.f32 %v757_v36  ;;  %vm780_vm9 = vcmp.eq.f32.partialorder %v346_v59, 8.507059e+37 }
 0x138   : > { %v577_v45 = vpop.eup %576  ;;  %v760_v47 = vadd.f32 1.0, %v575_v42  ;;  %v325_v51 = vmul.f32 1.442695, %v311_v44  ;;  %v349_v33 = vor.u32 1.1754944e-38, %v348_v16 }
 0x139   : > { %v579_v49 = vpop.eup %578  ;;  %v368_v50 = vmul.f32 %v577_v45, %v331_v31  ;;  %vm373_vm6 = vweird.f32 %v577_v45 }
 0x13a   : > { %v581_v52 = vpop.eup %580  ;;  %v353_v55 = vmul.f32 %v579_v49, %v330_v35  ;;  %586 = vrcp.f32 %v760_v47  ;;  %vm358_vm7 = vweird.f32 %v579_v49  ;;  %vm374_vm10 = vmor %vm372_vm2, %vm373_vm6  ;;  %v421_v26 = vand.u32 2147483647, %v760_v47 }
 0x13b   : > { %v583_v56 = vpop.eup %582  ;;  %v369_v57 = vsub.f32 1.0, %v368_v50  ;;  %v772_v60 = vadd.f32 1.0, %v581_v52  ;;  %588 = vpow2.f32 %v327_v48  ;;  %v423_v27 = vand.u32 2147483648, %v760_v47  ;;  %vm359_vm11 = vmor %vm357_vm3, %vm358_vm7 }
 0x13c   : > { %v585_v61 = vpop.eup %584  ;;  %v354_v62 = vsub.f32 1.0, %v353_v55  ;;  %v774_v3 = vadd.f32 1.0, %v583_v56  ;;  %590 = vpow2.f32 %v325_v51  ;;  %vm417_vm13 = vweird.f32 %v760_v47 }
 0x13d   : > { %v370_v7 = vmul.f32 %v577_v45, %v369_v57  ;;  %v338_v8 = vmul.f32 %v585_v61, %v757_v36  ;;  %592 = vrcp.f32 %v772_v60  ;;  %vm343_vm12 = vweird.f32 %v585_v61 }
 0x13e   : > { %v355_v15 = vmul.f32 %v579_v49, %v354_v62  ;;  %594 = vrcp.f32 %v774_v3  ;;  %vm344_vm14 = vmor %vm342_vm8, %vm343_vm12  ;;  %vm809_vm15 = vcmp.eq.f32.partialorder %v421_v26, 8.507059e+37  ;;  %vm402_vm1 = vweird.f32 %v772_v60 }
 0x13f   : > { %v371_v17 = vadd.f32 %v577_v45, %v370_v7  ;;  %v339_v22 = vsub.f32 1.0, %v338_v8  ;;  %v408_v55 = vand.u32 2147483648, %v772_v60  ;;  %v391_v58 = vand.u32 2147483647, %v774_v3 }
 0x140   : > { %v587_v24 = vpop.eup %586  ;;  %v356_v25 = vadd.f32 %v579_v49, %v355_v15  ;;  %v393_v59 = vand.u32 2147483648, %v774_v3  ;;  %vm387_vm7 = vweird.f32 %v774_v3 }
 0x141   : > { %v375_v28 = vsel %vm374_vm10, %v577_v45, %v371_v17  ;;  %v340_v29 = vmul.f32 %v585_v61, %v339_v22  ;;  %v413_v30 = vmul.f32 %v587_v24, %v760_v47  ;;  %v589_v32 = vpop.eup %588  ;;  %vm418_vm0 = vweird.f32 %v587_v24 }
 0x142   : > { %v380_v31 = vsel %vm762_vm4, %v379_v54, %v375_v28  ;;  %v360_v34 = vsel %vm359_vm11, %v579_v49, %v356_v25  ;;  %v591_v35 = vpop.eup %590  ;;  %v424_v45 = vor.u32 1.1754944e-38, %v423_v27  ;;  %v818_v48 = vadd.f32 1.0, %v589_v32  ;;  %vm419_vm2 = vmor %vm417_vm13, %vm418_vm0 }
 0x143   : > { %v461_v37 = vmul.f32 %v380_v31, %v649_v2  ;;  %v462_v38 = vmul.f32 %v380_v31, %v653_v4  ;;  %v365_v39 = vsel %vm767_vm5, %v364_v63, %v360_v34  ;;  %v341_v40 = vadd.f32 %v585_v61, %v340_v29  ;;  %v593_v41 = vpop.eup %592 }
 0x144   : > { %v459_v42 = vmul.f32 %v365_v39, %v663_v9  ;;  %v460_v43 = vmul.f32 %v365_v39, %v665_v10  ;;  %v414_v44 = vsub.f32 1.0, %v413_v30  ;;  %v398_v46 = vmul.f32 %v593_v41, %v772_v60  ;;  %v595_v9 = vpop.eup %594 }
 0x145   : > { %477 = vst [vmem:[%s795_s28 + $0x20] sm:$0xff] %v461_v37  ;;  %v345_v4 = vsel %vm344_vm14, %v585_v61, %v341_v40  ;;  %v820_v49 = vadd.f32 1.0, %v591_v35  ;;  %v383_v53 = vmul.f32 %v595_v9, %v774_v3  ;;  %596 = vrcp.f32 %v818_v48 }
 0x146   : > { %478 = vst [vmem:[%s795_s28 + $0x28] sm:$0xff] %v462_v38  ;;  %v350_v10 = vsel %vm780_vm9, %v349_v33, %v345_v4  ;;  %v415_v36 = vmul.f32 %v587_v24, %v414_v44  ;;  %v399_v52 = vsub.f32 1.0, %v398_v46  ;;  %vm403_vm3 = vweird.f32 %v593_v41 }
 0x147   : > { %475 = vst [vmem:[%s795_s28 + $0x10] sm:$0xff] %v459_v42  ;;  %v457_v50 = vmul.f32 %v350_v10, %v645_v0  ;;  %v458_v51 = vmul.f32 %v350_v10, %v647_v1  ;;  %v406_v0 = vand.u32 2147483647, %v772_v60  ;;  %v384_v1 = vsub.f32 1.0, %v383_v53  ;;  %vm404_vm5 = vmor %vm402_vm1, %vm403_vm3 }
 0x148   : > { %476 = vst [vmem:[%s795_s28 + $0x18] sm:$0xff] %v460_v43  ;;  %v416_v54 = vadd.f32 %v587_v24, %v415_v36  ;;  %v400_v56 = vmul.f32 %v593_v41, %v399_v52  ;;  %598 = vrcp.f32 %v820_v49  ;;  %vm388_vm4 = vweird.f32 %v595_v9 }
 0x149   : > { %473 = vst [vmem:[%s795_s28] sm:$0xff] %v457_v50  ;;  %v385_v47 = vmul.f32 %v595_v9, %v384_v1  ;;  %v409_v8 = vor.u32 1.1754944e-38, %v408_v55  ;;  %vm407_vm6 = vcmp.eq.f32.partialorder %v406_v0, 8.507059e+37  ;;  %vm389_vm8 = vmor %vm387_vm7, %vm388_vm4  ;;  %vm392_vm9 = vcmp.eq.f32.partialorder %v391_v58, 8.507059e+37 }
 0x14a   : > { %474 = vst [vmem:[%s795_s28 + $0x8] sm:$0xff] %v458_v51  ;;  %v420_v57 = vsel %vm419_vm2, %v587_v24, %v416_v54  ;;  %v401_v62 = vadd.f32 %v593_v41, %v400_v56  ;;  %v453_v30 = vand.u32 2147483648, %v818_v48  ;;  %vm447_vm11 = vweird.f32 %v818_v48 }
 0x14b   : > { %v425_v61 = vsel %vm809_vm15, %v424_v45, %v420_v57  ;;  %v386_v16 = vadd.f32 %v595_v9, %v385_v47  ;;  %v597_v17 = vpop.eup %596  ;;  %v438_v31 = vand.u32 2147483648, %v820_v49  ;;  %vm432_vm15 = vweird.f32 %v820_v49 }
 0x14c   : > { %v467_v63 = vmul.f32 %v425_v61, %v671_v13  ;;  %v468_v7 = vmul.f32 %v425_v61, %v673_v14  ;;  %v405_v15 = vsel %vm404_vm5, %v593_v41, %v401_v62  ;;  %v394_v13 = vor.u32 1.1754944e-38, %v393_v59 }
 0x14d   : > { %v410_v22 = vsel %vm407_vm6, %v409_v8, %v405_v15  ;;  %v390_v23 = vsel %vm389_vm8, %v595_v9, %v386_v16  ;;  %v443_v24 = vmul.f32 %v597_v17, %v818_v48  ;;  %vm448_vm10 = vweird.f32 %v597_v17 }
 0x14e   : > { %483 = vst [vmem:[%s795_s28 + $0x50] sm:$0xff] %v467_v63  ;;  %v465_v14 = vmul.f32 %v410_v22, %v655_v5  ;;  %v466_v60 = vmul.f32 %v410_v22, %v657_v6  ;;  %v599_v25 = vpop.eup %598  ;;  %v395_v26 = vsel %vm392_vm9, %v394_v13, %v390_v23  ;;  %v451_v6 = vand.u32 2147483647, %v818_v48  ;;  %vm449_vm13 = vmor %vm447_vm11, %vm448_vm10 }
 0x14f   : > { %484 = vst [vmem:[%s795_s28 + $0x58] sm:$0xff] %v468_v7  ;;  %v463_v3 = vmul.f32 %v395_v26, %v667_v11  ;;  %v464_v27 = vmul.f32 %v395_v26, %v669_v12  ;;  %v444_v28 = vsub.f32 1.0, %v443_v24  ;;  %v428_v29 = vmul.f32 %v599_v25, %v820_v49 }
 0x150   : > { %481 = vst [vmem:[%s795_s28 + $0x40] sm:$0xff] %v465_v14  ;;  %vm433_vm12 = vweird.f32 %v599_v25  ;;  %v436_v12 = vand.u32 2147483647, %v820_v49  ;;  %v454_v33 = vor.u32 1.1754944e-38, %v453_v30  ;;  %vm452_vm14 = vcmp.eq.f32.partialorder %v451_v6, 8.507059e+37 }
 0x151   : > { %482 = vst [vmem:[%s795_s28 + $0x48] sm:$0xff] %v466_v60  ;;  %v445_v5 = vmul.f32 %v597_v17, %v444_v28  ;;  %v429_v32 = vsub.f32 1.0, %v428_v29  ;;  %vm434_vm0 = vmor %vm432_vm15, %vm433_vm12  ;;  %v439_v39 = vor.u32 1.1754944e-38, %v438_v31 }
 0x152   : > { %479 = vst [vmem:[%s795_s28 + $0x30] sm:$0xff] %v463_v3  ;;  %vm437_vm1 = vcmp.eq.f32.partialorder %v436_v12, 8.507059e+37 }
 0x153   : > { %480 = vst [vmem:[%s795_s28 + $0x38] sm:$0xff] %v464_v27  ;;  %v446_v11 = vadd.f32 %v597_v17, %v445_v5  ;;  %v430_v34 = vmul.f32 %v599_v25, %v429_v32 }
 0x155   : > { %v450_v35 = vsel %vm449_vm13, %v597_v17, %v446_v11  ;;  %v431_v37 = vadd.f32 %v599_v25, %v430_v34 }
 0x156   : > { %v455_v38 = vsel %vm452_vm14, %v454_v33, %v450_v35 }
 0x157   : > { %v471_v40 = vmul.f32 %v455_v38, %v685_v20  ;;  %v472_v41 = vmul.f32 %v455_v38, %v687_v21  ;;  %v435_v42 = vsel %vm434_vm0, %v599_v25, %v431_v37 }
 0x158   : > { %v440_v43 = vsel %vm437_vm1, %v439_v39, %v435_v42 }
 0x159   : > { %487 = vst [vmem:[%s795_s28 + $0x70] sm:$0xff] %v471_v40  ;;  %v469_v44 = vmul.f32 %v440_v43, %v681_v18  ;;  %v470_v2 = vmul.f32 %v440_v43, %v683_v19 }
 0x15a   : > { %488 = vst [vmem:[%s795_s28 + $0x78] sm:$0xff] %v472_v41 }
 0x15b   : > { %485 = vst [vmem:[%s795_s28 + $0x60] sm:$0xff] %v469_v44 }
 0x15c   : > { %486 = vst [vmem:[%s795_s28 + $0x68] sm:$0xff] %v470_v2 }
 0x15d PF: > { %s13_s12 = sadd.s32 1, %s606_s12  }
 0x15e   : > { %p10_p4 = scmp.ge.s32.totalorder %s13_s12, 4  }
 0x160   :  { %12 = sbr.rel (!%p10_p4) target bundleno = 1 (0x1), region = 62 }

</bundles_post_ra>
